<compile_context>
chip_gen: v6e
topology: v6e:2x2x1
jax: 0.10.0
libtpu: 0.0.40
codegen_flags: <defaults>
</compile_context>

<pallas_src>
import jax
import jax.numpy as jnp
from jax.experimental import pallas as pl
from jax.experimental.pallas import tpu as pltpu


def _mlp_kernel(x_ref, wpack_ref, o_ref):
    # x_ref:     (1, B)  batch along lanes (lane-dense)
    # wpack_ref: (H, 4)  packed params: col 0 = w1, col 1 = b1, col 2 = w2, col 3 = b2 (replicated)
    # o_ref:     (1, B)  lane-dense output slab
    x = x_ref[...]                       # (1, B)
    w1 = wpack_ref[:, 0:1]               # (H, 1)
    b1 = wpack_ref[:, 1:2]               # (H, 1)
    w2 = wpack_ref[:, 2:3]               # (H, 1)
    b2 = wpack_ref[0:1, 3:4]             # (1, 1)
    # hidden = relu(W1 * x + b1): (H,1)*(1,B) broadcast -> (H, B); pure VPU, no MXU.
    h = jnp.maximum(w1 * x + b1, 0.0)
    # out = sum_h(hidden * W2) + b2: VPU multiply + XLU sublane reduction, no MXU.
    y = jnp.sum(h * w2, axis=0, keepdims=True) + b2
    o_ref[...] = y.astype(o_ref.dtype)


def net_forward(x, w1, b1, w2, b2):
    """Forward pass of Net.

    x:  (B, 1) float
    w1: (H, 1) hidden.weight   (PyTorch (out_features, in_features) layout, F == 1)
    b1: (H,)   hidden.bias
    w2: (1, H) predict.weight  (O == 1)
    b2: (1,)   predict.bias
    Returns (B, 1) float32.
    """
    B, F = x.shape
    H = w1.shape[0]
    O = w2.shape[0]
    assert F == 1 and O == 1, "kernel is specialized for n_features=1, n_output=1"

    # Lane-dense layout: batch along lanes. (B,1)->(1,B) is a pure reshape, no pad needed:
    # the full-array block lets Mosaic mask the lane tail itself.
    x_row = x.reshape(1, B).astype(jnp.float32)

    # Pack all parameters into a single (H, 4) operand -> one DMA instead of four.
    wpack = jnp.concatenate(
        [
            w1.reshape(H, 1),
            b1.reshape(H, 1),
            w2.reshape(H, 1),
            jnp.broadcast_to(b2.reshape(1, 1), (H, 1)),
        ],
        axis=1,
    ).astype(jnp.float32)

    # Advisory cost estimate: ~5 flops per (hidden unit, batch element), I/O ≈ 2 rows of B f32.
    cost = pl.CostEstimate(
        flops=5 * H * B,
        transcendentals=0,
        bytes_accessed=2 * 4 * B + 4 * H * 4,
    )

    y_row = pl.pallas_call(
        _mlp_kernel,
        out_shape=jax.ShapeDtypeStruct((1, B), jnp.float32),
        grid=(1,),  # single step: whole problem is a few KiB, far below any VMEM limit
        in_specs=[
            pl.BlockSpec((1, B), lambda i: (0, 0)),   # x: one full lane-dense block
            pl.BlockSpec((H, 4), lambda i: (0, 0)),   # packed params: VMEM-resident
        ],
        out_specs=pl.BlockSpec((1, B), lambda i: (0, 0)),
        compiler_params=pltpu.CompilerParams(
            dimension_semantics=("arbitrary",)
        ),
        cost_estimate=cost,
    )(x_row, wpack)

    return y_row.reshape(B, 1)


if __name__ == "__main__":
    # Shapes implied by the module usage: batch=1000 (linspace), F=1, H=32, O=1.
    B, F, H, O = 1000, 1, 32, 1

    key = jax.random.PRNGKey(0)
    k1, k2, k3, k4 = jax.random.split(key, 4)

    # Deterministic params mimicking torch.nn.Linear's U(-1/sqrt(fan_in), 1/sqrt(fan_in)),
    # stored in PyTorch (out_features, in_features) convention.
    bound1 = 1.0 / jnp.sqrt(F)
    bound2 = 1.0 / jnp.sqrt(H)
    w1 = jax.random.uniform(k1, (H, F), jnp.float32, -bound1, bound1)
    b1 = jax.random.uniform(k2, (H,), jnp.float32, -bound1, bound1)
    w2 = jax.random.uniform(k3, (O, H), jnp.float32, -bound2, bound2)
    b2 = jax.random.uniform(k4, (O,), jnp.float32, -bound2, bound2)

    # Input analogous to torch.unsqueeze(torch.linspace(-1, 1, 1000), dim=1)
    x = jnp.linspace(-1.0, 1.0, B, dtype=jnp.float32).reshape(B, 1)

    y = net_forward(x, w1, b1, w2, b2)
    jax.block_until_ready(y)

    # Pure-JAX reference (PyTorch convention: y = relu(x @ W1^T + b1) @ W2^T + b2)
    y_ref = jnp.maximum(x @ w1.T + b1, 0.0) @ w2.T + b2
    assert y.shape == (B, O)
    assert jnp.allclose(y, y_ref, atol=1e-5, rtol=1e-5)

    print("KERNEL_OK")
</pallas_src>

<mosaic_0001>
module attributes {stable_mosaic.version = 11 : i64} {
  func.func @_mlp_kernel(%arg0: i32, %arg1: memref<1x1000xf32, #tpu.memory_space<vmem>>, %arg2: memref<32x4xf32, #tpu.memory_space<vmem>>, %arg3: memref<1x1000xf32, #tpu.memory_space<vmem>>) attributes {dimension_semantics = [#tpu.dimension_semantics<arbitrary>], iteration_bounds = array<i64: 1>, scalar_prefetch = 0 : i64, scratch_operands = 0 : i64, tpu.core_type = #tpu.core_type<tc>, window_params = [{pipeline_mode = #tpu.pipeline_mode<synchronous>, transform_indices = @transform_0, window_bounds = array<i64: 1, 1000>}, {pipeline_mode = #tpu.pipeline_mode<synchronous>, transform_indices = @transform_1, window_bounds = array<i64: 32, 4>}, {pipeline_mode = #tpu.pipeline_mode<synchronous>, transform_indices = @transform_2, window_bounds = array<i64: 1, 1000>}]} {
    %c0 = arith.constant 0 : index
    %c0_0 = arith.constant 0 : index
    %0 = vector.load %arg1[%c0, %c0_0] : memref<1x1000xf32, #tpu.memory_space<vmem>>, vector<1x1000xf32>
    %c0_1 = arith.constant 0 : index
    %c0_2 = arith.constant 0 : index
    %1 = vector.load %arg2[%c0_1, %c0_2] : memref<32x4xf32, #tpu.memory_space<vmem>>, vector<32x1xf32>
    %c0_3 = arith.constant 0 : index
    %c1 = arith.constant 1 : index
    %2 = vector.load %arg2[%c0_3, %c1] : memref<32x4xf32, #tpu.memory_space<vmem>>, vector<32x1xf32>
    %c0_4 = arith.constant 0 : index
    %c2 = arith.constant 2 : index
    %3 = vector.load %arg2[%c0_4, %c2] : memref<32x4xf32, #tpu.memory_space<vmem>>, vector<32x1xf32>
    %c0_5 = arith.constant 0 : index
    %c3 = arith.constant 3 : index
    %4 = vector.load %arg2[%c0_5, %c3] : memref<32x4xf32, #tpu.memory_space<vmem>>, vector<1x1xf32>
    %5 = vector.broadcast %1 : vector<32x1xf32> to vector<32x1000xf32>
    %6 = vector.broadcast %0 : vector<1x1000xf32> to vector<32x1000xf32>
    %7 = arith.mulf %5, %6 : vector<32x1000xf32>
    %8 = vector.broadcast %2 : vector<32x1xf32> to vector<32x1000xf32>
    %9 = arith.addf %7, %8 : vector<32x1000xf32>
    %cst = arith.constant 0.000000e+00 : f32
    %10 = vector.broadcast %cst : f32 to vector<32x1000xf32>
    %11 = arith.maximumf %9, %10 : vector<32x1000xf32>
    %12 = vector.broadcast %3 : vector<32x1xf32> to vector<32x1000xf32>
    %13 = arith.mulf %11, %12 : vector<32x1000xf32>
    %cst_6 = arith.constant dense<0.000000e+00> : vector<1000xf32>
    %14 = vector.multi_reduction <add>, %13, %cst_6 [0] : vector<32x1000xf32> to vector<1000xf32>
    %15 = vector.shape_cast %14 : vector<1000xf32> to vector<1x1000xf32>
    %16 = vector.broadcast %4 : vector<1x1xf32> to vector<1x1000xf32>
    %17 = arith.addf %15, %16 : vector<1x1000xf32>
    %c0_7 = arith.constant 0 : index
    %c0_8 = arith.constant 0 : index
    %18 = vector.load %arg3[%c0_7, %c0_8] : memref<1x1000xf32, #tpu.memory_space<vmem>>, vector<1x1000xf32>
    tpu.vector_store %arg3[%c0_7, %c0_8], %17 {strides = array<i32>} : memref<1x1000xf32, #tpu.memory_space<vmem>>, vector<1x1000xf32>,
    return
  }
  func.func @transform_0(%arg0: i32) -> (i32, i32) {
    %c0_i32 = arith.constant 0 : i32
    %c0_i32_0 = arith.constant 0 : i32
    %c0_i32_1 = arith.constant 0 : i32
    return %c0_i32, %c0_i32_0 : i32, i32
  }
  func.func @transform_1(%arg0: i32) -> (i32, i32) {
    %c0_i32 = arith.constant 0 : i32
    %c0_i32_0 = arith.constant 0 : i32
    %c0_i32_1 = arith.constant 0 : i32
    return %c0_i32, %c0_i32_0 : i32, i32
  }
  func.func @transform_2(%arg0: i32) -> (i32, i32) {
    %c0_i32 = arith.constant 0 : i32
    %c0_i32_0 = arith.constant 0 : i32
    %c0_i32_1 = arith.constant 0 : i32
    return %c0_i32, %c0_i32_0 : i32, i32
  }
}

</mosaic_0001>

<bundles_post_ra>
// kernel: tpu_custom_call.1
= control target key start
LH: loop header
LB: loop body
LE: loop exit
PB: predicated region body
PF: predicated region fallthrough
CT: control target
= control target key end

     0   :  { %v443_v2 = vmov 0   ;;  %s587_s0 = inlined_call_operand.vmem [shape: f32[1,1000], index: 0, kind: input, shape index: {}]   ;;  %s588_s1 = inlined_call_operand.vmem [shape: f32[32,4], index: 1, kind: input, shape index: {}]   ;;  %s589_s2 = inlined_call_operand.hbm [shape: f32[1,1000], index: 2, kind: output, shape index: {}]  }
   0x1   :  { %v15_v0 = vld [vmem:[%s588_s1 + $0x10] sm:$0xff]  ;;  %v13_v1 = vld [vmem:[%s588_s1] sm:$0xff]  ;;  %413 = vset.pattern.permute.xlu1 %v443_v2  ;;  %412 = vset.pattern.permute.xlu0 %v443_v2 }
   0x2   :  { %7 = vsyncpa [#allocation3], 0  ;;  %30 = vperm.xlu1 %413, %v15_v0   ;;  %20 = vperm.xlu0 %412, %v13_v1   ;;  %v14_v3 = vld [vmem:[%s588_s1 + $0x8] sm:$0xff]  ;;  %v444_v4 = vmov 1   ;;  %v16_v5 = vld [vmem:[%s588_s1 + $0x18] sm:$0xff]  ;;  %v445_v6 = vmov 2   ;;  %v39_v9 = vlaneseq }
   0x3   :  { %v17_v7 = vld [vmem:[%s588_s1] sm:$0x1]  ;;  %v446_v8 = vmov 3   ;;  %v447_v20 = vmov 1966171168   ;;  %vm302_vm0 = vcmask 850944  }
   0x4   :  { %v480_v10 = vshrl.u32 %v39_v9, 7  ;;  %v12_v12 = vld [vmem:[%s587_s0] sm:$0xff]  ;;  %v493_v21 = vunpack.c.l.s4 %v447_v20  ;;  %s448_s0 = smov [#allocation2]   ;;  %vm389_vm1 = vcmp.lt.s32.totalorder %v39_v9, 1000 }
   0x5   :  { %s398_s1 = sshll.u32 %s448_s0, 4  ;;  %s399_s1 = int_to_ptr.vmem [resolvable:$true] %s398_s1 }
   0x6   :  { %414 = vset.pattern.permute.xlu1 %v444_v4  ;;  %25 = vperm.xlu0 %412, %v14_v3   ;;  %v41_v11 = vsub.s32 0, %v480_v10  ;;  %v45_v13 = vsub.s32 1, %v480_v10  ;;  %v49_v14 = vsub.s32 2, %v480_v10  ;;  %v53_v15 = vsub.s32 3, %v480_v10  ;;  %s421_s21 = scalar_lea.vmem %s399_s1, 128  ;;  %p426_p1 = scmp.lt.s32.totalorder %s399_s1, %s399_s1 }
   0x7   :  { %112 = vperm.xlu1 %414, %v13_v1   ;;  %v57_v16 = vsub.s32 4, %v480_v10  ;;  %v61_v17 = vsub.s32 5, %v480_v10  ;;  %v65_v18 = vsub.s32 6, %v480_v10  ;;  %v69_v19 = vsub.s32 7, %v480_v10  ;;  %p422_p0 = scmp.ne.s32.totalorder %s399_s1, %s421_s21  ;;  %p427_p2 = scmp.lt.s32.totalorder %s421_s21, %s421_s21 }
   0x8   :  { %v42_v22 = vrot.slane %v12_v12, %v41_v11  ;;  %v46_v23 = vrot.slane %v12_v12, %v45_v13  ;;  %v50_v24 = vrot.slane %v12_v12, %v49_v14  ;;  %v54_v25 = vrot.slane %v12_v12, %v53_v15 }
   0x9   :  { %v58_v26 = vrot.slane %v12_v12, %v57_v16  ;;  %v62_v29 = vrot.slane %v12_v12, %v61_v17  ;;  %v66_v30 = vrot.slane %v12_v12, %v65_v18  ;;  %v70_v31 = vrot.slane %v12_v12, %v69_v19  ;;  %p428_p3 = por %p427_p2, %p426_p1 }
   0xa   :  { %415 = vset.pattern.permute.xlu0 %v444_v4  ;;  %v343_v32 = vunpack.c.0.s8 %v493_v21 }
   0xb   :  { %416 = vset.pattern.permute.xlu1 %v443_v2  ;;  %116 = vperm.xlu0 %415, %v14_v3   ;;  %p429_p4 = pnand %p428_p3, %p422_p0 }
   0xc   :  { %35 = vperm.xlu1 %416, %v16_v5  }
   0xf   :  { %124 = vperm.xlu0 %415, %v16_v5  }
  0x10   :  { %417 = vset.pattern.permute.xlu1 %v444_v4 }
  0x11   :  { %120 = vperm.xlu1 %417, %v15_v0  }
  0x13   :  { %419 = vset.pattern.permute.xlu0 %v445_v6 }
  0x14   :  { %196 = vperm.xlu0 %419, %v14_v3  }
  0x15   :  { %418 = vset.pattern.permute.xlu1 %v445_v6 }
  0x16   :  { %192 = vperm.xlu1 %418, %v13_v1  }
  0x18   :  { %420 = vset.pattern.permute.xlu0 %v446_v8 }
  0x19   :  { %318 = vperm.xlu0 %420, %v17_v7  }
  0x1a   :  { %200 = vperm.xlu1 %418, %v15_v0  }
  0x1e   :  { %204 = vperm.xlu1 %418, %v16_v5  }
  0x7d   :  { %v31_v27 = vpop.permute.xlu1 %30  ;;  %v21_v28 = vpop.permute.xlu0 %20 }
  0x7e   :  { %v79_v33 = vmul.f32 %v42_v22, %v21_v28  ;;  %v80_v34 = vmul.f32 %v46_v23, %v21_v28  ;;  %v81_v35 = vmul.f32 %v50_v24, %v21_v28  ;;  %v82_v36 = vmul.f32 %v54_v25, %v21_v28 }
  0x7f   :  { %v83_v37 = vmul.f32 %v58_v26, %v21_v28  ;;  %v84_v38 = vmul.f32 %v62_v29, %v21_v28  ;;  %v85_v39 = vmul.f32 %v66_v30, %v21_v28  ;;  %v86_v40 = vmul.f32 %v70_v31, %v21_v28 }
  0x80   :  { %v95_v41 = vmul.f32 %v42_v22, %v31_v27  ;;  %v96_v42 = vmul.f32 %v46_v23, %v31_v27  ;;  %v97_v43 = vmul.f32 %v50_v24, %v31_v27  ;;  %v98_v44 = vmul.f32 %v54_v25, %v31_v27 }
  0x81   :  { %v26_v45 = vpop.permute.xlu0 %25  ;;  %v99_v46 = vmul.f32 %v58_v26, %v31_v27  ;;  %v100_v47 = vmul.f32 %v62_v29, %v31_v27  ;;  %v101_v48 = vmul.f32 %v66_v30, %v31_v27  ;;  %v102_v49 = vmul.f32 %v70_v31, %v31_v27 }
  0x82   :  { %v113_v50 = vpop.permute.xlu1 %112  ;;  %v87_v51 = vmul.f32 %v42_v22, %v26_v45  ;;  %v88_v52 = vmul.f32 %v46_v23, %v26_v45  ;;  %v89_v53 = vmul.f32 %v50_v24, %v26_v45  ;;  %v90_v54 = vmul.f32 %v54_v25, %v26_v45 }
  0x83   :  { %v91_v55 = vmul.f32 %v58_v26, %v26_v45  ;;  %v92_v56 = vmul.f32 %v62_v29, %v26_v45  ;;  %v93_v57 = vmul.f32 %v66_v30, %v26_v45  ;;  %v94_v58 = vmul.f32 %v70_v31, %v26_v45 }
  0x84   :  { %v496_v59 = vadd.f32 %v113_v50, %v79_v33  ;;  %v498_v60 = vadd.f32 %v113_v50, %v80_v34  ;;  %v500_v61 = vadd.f32 %v113_v50, %v81_v35  ;;  %v502_v62 = vadd.f32 %v113_v50, %v82_v36 }
  0x85   :  { %v504_v63 = vadd.f32 %v113_v50, %v83_v37  ;;  %v506_v0 = vadd.f32 %v113_v50, %v84_v38  ;;  %v508_v1 = vadd.f32 %v113_v50, %v85_v39  ;;  %v510_v2 = vadd.f32 %v113_v50, %v86_v40 }
  0x86   :  { %v117_v3 = vpop.permute.xlu0 %116  ;;  %v159_v4 = vmax.f32 %v496_v59, 0.0  ;;  %v160_v5 = vmax.f32 %v498_v60, 0.0  ;;  %v161_v6 = vmax.f32 %v500_v61, 0.0  ;;  %v162_v7 = vmax.f32 %v502_v62, 0.0 }
  0x87   :  { %v36_v8 = vpop.permute.xlu1 %35  ;;  %v516_v11 = vadd.f32 %v117_v3, %v87_v51  ;;  %v518_v12 = vadd.f32 %v117_v3, %v88_v52  ;;  %v520_v13 = vadd.f32 %v117_v3, %v89_v53  ;;  %v522_v14 = vadd.f32 %v117_v3, %v90_v54 }
  0x88   :  { %v103_v15 = vmul.f32 %v42_v22, %v36_v8  ;;  %v104_v16 = vmul.f32 %v46_v23, %v36_v8  ;;  %v105_v17 = vmul.f32 %v50_v24, %v36_v8  ;;  %v106_v18 = vmul.f32 %v54_v25, %v36_v8 }
  0x89   :  { %v107_v19 = vmul.f32 %v58_v26, %v36_v8  ;;  %v108_v20 = vmul.f32 %v62_v29, %v36_v8  ;;  %v109_v27 = vmul.f32 %v66_v30, %v36_v8  ;;  %v110_v28 = vmul.f32 %v70_v31, %v36_v8 }
  0x8a   :  { %v125_v33 = vpop.permute.xlu0 %124  ;;  %v524_v34 = vadd.f32 %v117_v3, %v91_v55  ;;  %v526_v35 = vadd.f32 %v117_v3, %v92_v56  ;;  %v528_v36 = vadd.f32 %v117_v3, %v93_v57  ;;  %v530_v37 = vadd.f32 %v117_v3, %v94_v58 }
  0x8b   :  { %v532_v38 = vadd.f32 %v125_v33, %v103_v15  ;;  %v534_v39 = vadd.f32 %v125_v33, %v104_v16  ;;  %v536_v22 = vadd.f32 %v125_v33, %v105_v17  ;;  %v538_v23 = vadd.f32 %v125_v33, %v106_v18 }
  0x8c   :  { %v121_v24 = vpop.permute.xlu1 %120  ;;  %v540_v25 = vadd.f32 %v125_v33, %v107_v19  ;;  %v542_v26 = vadd.f32 %v125_v33, %v108_v20  ;;  %v544_v29 = vadd.f32 %v125_v33, %v109_v27  ;;  %v546_v30 = vadd.f32 %v125_v33, %v110_v28 }
  0x8d   :  { %v143_v31 = vadd.f32 %v121_v24, %v95_v41  ;;  %v144_v40 = vadd.f32 %v121_v24, %v96_v42  ;;  %v145_v45 = vadd.f32 %v121_v24, %v97_v43  ;;  %v146_v50 = vadd.f32 %v121_v24, %v98_v44 }
  0x8e   :  { %v147_v51 = vadd.f32 %v121_v24, %v99_v46  ;;  %v148_v52 = vadd.f32 %v121_v24, %v100_v47  ;;  %v149_v53 = vadd.f32 %v121_v24, %v101_v48  ;;  %v150_v54 = vadd.f32 %v121_v24, %v102_v49 }
  0x8f   :  { %v163_v55 = vmax.f32 %v504_v63, 0.0  ;;  %v164_v56 = vmax.f32 %v506_v0, 0.0  ;;  %v165_v57 = vmax.f32 %v508_v1, 0.0  ;;  %v166_v58 = vmax.f32 %v510_v2, 0.0  ;;  %v197_v18 = vpop.permute.xlu0 %196 }
  0x90   :  { %v167_v3 = vmax.f32 %v516_v11, 0.0  ;;  %v168_v8 = vmax.f32 %v518_v12, 0.0  ;;  %v169_v41 = vmax.f32 %v520_v13, 0.0  ;;  %v170_v42 = vmax.f32 %v522_v14, 0.0 }
  0x91   :  { %v193_v43 = vpop.permute.xlu1 %192  ;;  %v171_v44 = vmax.f32 %v524_v34, 0.0  ;;  %v172_v46 = vmax.f32 %v526_v35, 0.0  ;;  %v173_v47 = vmax.f32 %v528_v36, 0.0  ;;  %v174_v48 = vmax.f32 %v530_v37, 0.0 }
  0x92   :  { %v175_v49 = vmax.f32 %v143_v31, 0.0  ;;  %v176_v63 = vmax.f32 %v144_v40, 0.0  ;;  %v177_v0 = vmax.f32 %v145_v45, 0.0  ;;  %v178_v1 = vmax.f32 %v146_v50, 0.0 }
  0x93   :  { %v179_v2 = vmax.f32 %v147_v51, 0.0  ;;  %v180_v11 = vmax.f32 %v148_v52, 0.0  ;;  %v181_v12 = vmax.f32 %v149_v53, 0.0  ;;  %v182_v15 = vmax.f32 %v150_v54, 0.0 }
  0x94   :  { %v183_v13 = vmax.f32 %v532_v38, 0.0  ;;  %v184_v14 = vmax.f32 %v534_v39, 0.0  ;;  %v185_v16 = vmax.f32 %v536_v22, 0.0  ;;  %v186_v17 = vmax.f32 %v538_v23, 0.0 }
  0x95   :  { %v201_v19 = vpop.permute.xlu1 %200  ;;  %v187_v20 = vmax.f32 %v540_v25, 0.0  ;;  %v188_v27 = vmax.f32 %v542_v26, 0.0  ;;  %v189_v28 = vmax.f32 %v544_v29, 0.0  ;;  %v190_v33 = vmax.f32 %v546_v30, 0.0 }
  0x96   :  { %v207_v34 = vmul.f32 %v193_v43, %v159_v4  ;;  %v208_v35 = vmul.f32 %v193_v43, %v160_v5  ;;  %v209_v36 = vmul.f32 %v193_v43, %v161_v6  ;;  %v210_v37 = vmul.f32 %v193_v43, %v162_v7 }
  0x97   :  { %v211_v38 = vmul.f32 %v193_v43, %v163_v55  ;;  %v212_v39 = vmul.f32 %v193_v43, %v164_v56  ;;  %v213_v22 = vmul.f32 %v193_v43, %v165_v57  ;;  %v214_v23 = vmul.f32 %v193_v43, %v166_v58 }
  0x98   :  { %v215_v24 = vmul.f32 %v197_v18, %v167_v3  ;;  %v216_v25 = vmul.f32 %v197_v18, %v168_v8  ;;  %v217_v26 = vmul.f32 %v197_v18, %v169_v41  ;;  %v218_v29 = vmul.f32 %v197_v18, %v170_v42 }
  0x99   :  { %v205_v59 = vpop.permute.xlu1 %204  ;;  %v219_v4 = vmul.f32 %v197_v18, %v171_v44  ;;  %v220_v30 = vmul.f32 %v197_v18, %v172_v46  ;;  %v221_v60 = vmul.f32 %v197_v18, %v173_v47  ;;  %v222_v5 = vmul.f32 %v197_v18, %v174_v48 }
  0x9a   :  { %v223_v31 = vmul.f32 %v201_v19, %v175_v49  ;;  %v224_v61 = vmul.f32 %v201_v19, %v176_v63  ;;  %v225_v6 = vmul.f32 %v201_v19, %v177_v0  ;;  %v226_v40 = vmul.f32 %v201_v19, %v178_v1 }
  0x9b   :  { %v227_v62 = vmul.f32 %v201_v19, %v179_v2  ;;  %v228_v7 = vmul.f32 %v201_v19, %v180_v11  ;;  %v229_v45 = vmul.f32 %v201_v19, %v181_v12  ;;  %v230_v50 = vmul.f32 %v201_v19, %v182_v15 }
  0x9c   :  { %v231_v51 = vmul.f32 %v205_v59, %v183_v13  ;;  %v232_v52 = vmul.f32 %v205_v59, %v184_v14  ;;  %v233_v53 = vmul.f32 %v205_v59, %v185_v16  ;;  %v234_v54 = vmul.f32 %v205_v59, %v186_v17 }
  0x9d   :  { %v235_v55 = vmul.f32 %v205_v59, %v187_v20  ;;  %v236_v56 = vmul.f32 %v205_v59, %v188_v27  ;;  %v237_v57 = vmul.f32 %v205_v59, %v189_v28  ;;  %v238_v58 = vmul.f32 %v205_v59, %v190_v33 }
  0x9e   :  { %v239_v3 = vadd.f32 %v215_v24, %v207_v34  ;;  %v248_v8 = vadd.f32 %v216_v25, %v208_v35  ;;  %v257_v41 = vadd.f32 %v217_v26, %v209_v36  ;;  %v266_v42 = vadd.f32 %v218_v29, %v210_v37 }
  0x9f   :  { %v275_v43 = vadd.f32 %v219_v4, %v211_v38  ;;  %v284_v44 = vadd.f32 %v220_v30, %v212_v39  ;;  %v293_v46 = vadd.f32 %v221_v60, %v213_v22  ;;  %v303_v47 = vsel %vm302_vm0, %v214_v23, 0.0 }
  0xa0   :  { %v240_v48 = vadd.f32 %v239_v3, %v223_v31  ;;  %v249_v49 = vadd.f32 %v248_v8, %v224_v61  ;;  %v258_v63 = vadd.f32 %v257_v41, %v225_v6  ;;  %v267_v0 = vadd.f32 %v266_v42, %v226_v40  ;;  %v319_v8 = vpop.permute.xlu0 %318 }
  0xa1   :  { %v276_v1 = vadd.f32 %v275_v43, %v227_v62  ;;  %v285_v2 = vadd.f32 %v284_v44, %v228_v7  ;;  %v294_v11 = vadd.f32 %v293_v46, %v229_v45  ;;  %v304_v12 = vsel %vm302_vm0, %v222_v5, 0.0 }
  0xa2   :  { %v241_v15 = vadd.f32 %v240_v48, %v231_v51  ;;  %v250_v13 = vadd.f32 %v249_v49, %v232_v52  ;;  %v259_v14 = vadd.f32 %v258_v63, %v233_v53  ;;  %v268_v16 = vadd.f32 %v267_v0, %v234_v54 }
  0xa3   :  { %v277_v17 = vadd.f32 %v276_v1, %v235_v55  ;;  %v286_v18 = vadd.f32 %v285_v2, %v236_v56  ;;  %v295_v19 = vadd.f32 %v294_v11, %v237_v57  ;;  %v305_v20 = vadd.f32 %v304_v12, %v303_v47 }
  0xa4   :  { %v242_v27 = vrot.slane %v241_v15, 4  ;;  %v251_v28 = vrot.slane %v250_v13, 4  ;;  %v260_v33 = vrot.slane %v259_v14, 4  ;;  %v269_v34 = vrot.slane %v268_v16, 4 }
  0xa5   :  { %v278_v35 = vrot.slane %v277_v17, 4  ;;  %v287_v36 = vrot.slane %v286_v18, 4  ;;  %v296_v37 = vrot.slane %v295_v19, 4  ;;  %v306_v38 = vsel %vm302_vm0, %v230_v50, 0.0 }
  0xa6   :  { %v243_v39 = vadd.f32 %v242_v27, %v241_v15  ;;  %v252_v22 = vadd.f32 %v251_v28, %v250_v13  ;;  %v261_v23 = vadd.f32 %v260_v33, %v259_v14  ;;  %v270_v24 = vadd.f32 %v269_v34, %v268_v16 }
  0xa7   :  { %v279_v25 = vadd.f32 %v278_v35, %v277_v17  ;;  %v288_v26 = vadd.f32 %v287_v36, %v286_v18  ;;  %v297_v29 = vadd.f32 %v296_v37, %v295_v19  ;;  %v307_v59 = vadd.f32 %v306_v38, %v305_v20 }
  0xa8   :  { %v244_v4 = vrot.slane %v243_v39, 2  ;;  %v253_v30 = vrot.slane %v252_v22, 2  ;;  %v262_v60 = vrot.slane %v261_v23, 2  ;;  %v271_v5 = vrot.slane %v270_v24, 2 }
  0xa9   :  { %v280_v31 = vrot.slane %v279_v25, 2  ;;  %v289_v61 = vrot.slane %v288_v26, 2  ;;  %v298_v6 = vrot.slane %v297_v29, 2  ;;  %v308_v40 = vsel %vm302_vm0, %v238_v58, 0.0 }
  0xaa   :  { %v245_v62 = vadd.f32 %v244_v4, %v243_v39  ;;  %v254_v7 = vadd.f32 %v253_v30, %v252_v22  ;;  %v263_v45 = vadd.f32 %v262_v60, %v261_v23  ;;  %v272_v50 = vadd.f32 %v271_v5, %v270_v24 }
  0xab   :  { %v281_v51 = vadd.f32 %v280_v31, %v279_v25  ;;  %v290_v52 = vadd.f32 %v289_v61, %v288_v26  ;;  %v299_v53 = vadd.f32 %v298_v6, %v297_v29  ;;  %v309_v54 = vadd.f32 %v308_v40, %v307_v59 }
  0xac   :  { %v246_v55 = vrot.slane %v245_v62, 1  ;;  %v255_v56 = vrot.slane %v254_v7, 1  ;;  %v264_v57 = vrot.slane %v263_v45, 1  ;;  %v273_v3 = vrot.slane %v272_v50, 1 }
  0xad   :  { %v282_v41 = vrot.slane %v281_v51, 1  ;;  %v291_v42 = vrot.slane %v290_v52, 1  ;;  %v300_v43 = vrot.slane %v299_v53, 1  ;;  %v310_v44 = vrot.slane %v309_v54, 4 }
  0xae   :  { %v247_v46 = vadd.f32 %v246_v55, %v245_v62  ;;  %v256_v47 = vadd.f32 %v255_v56, %v254_v7  ;;  %v265_v58 = vadd.f32 %v264_v57, %v263_v45  ;;  %v274_v48 = vadd.f32 %v273_v3, %v272_v50 }
  0xaf   :  { %v283_v49 = vadd.f32 %v282_v41, %v281_v51  ;;  %v292_v63 = vadd.f32 %v291_v42, %v290_v52  ;;  %v311_v0 = vadd.f32 %v310_v44, %v309_v54  ;;  %v301_v13 = vadd.f32 %v300_v43, %v299_v53 }
  0xb0   :  { %v321_v1 = vadd.f32 %v319_v8, %v247_v46  ;;  %v322_v2 = vadd.f32 %v319_v8, %v256_v47  ;;  %v323_v11 = vadd.f32 %v319_v8, %v265_v58  ;;  %v324_v12 = vadd.f32 %v319_v8, %v274_v48 }
  0xb1   :  { %v312_v15 = vrot.slane %v311_v0, 2  ;;  %v325_v14 = vadd.f32 %v319_v8, %v283_v49  ;;  %v346_v16 = vsub.s32 %v343_v32, %v480_v10  ;;  %v326_v18 = vadd.f32 %v319_v8, %v292_v63 }
  0xb2   :  { %v337_v19 = vcombine.low %v321_v1, %v322_v2  ;;  %v338_v20 = vcombine.low %v323_v11, %v324_v12  ;;  %v327_v28 = vadd.f32 %v319_v8, %v301_v13 }
  0xb3   :  { %v313_v17 = vadd.f32 %v312_v15, %v311_v0  ;;  %v339_v34 = vcombine.low %v325_v14, %v326_v18 }
  0xb4   :  { %v347_v35 = vrot.slane %v337_v19, %v346_v16  ;;  %v354_v36 = vrot.slane %v338_v20, %v346_v16 }
  0xb5   :  { %v314_v27 = vrot.slane %v313_v17, 1  ;;  %v361_v39 = vrot.slane %v339_v34, %v346_v16 }
  0xb6   :  { %v369_v22 = vcombine.low %v347_v35, %v354_v36 }
  0xb7   :  { %v315_v33 = vadd.f32 %v314_v27, %v313_v17 }
  0xb8   :  { %v377_v25 = vrot.slane %v369_v22, %v346_v16 }
  0xb9   :  { %v328_v37 = vadd.f32 %v319_v8, %v315_v33 }
  0xbb   :  { %v340_v38 = vcombine.low %v327_v28, %v328_v37 }
  0xbd   :  { %v368_v23 = vrot.slane %v340_v38, %v346_v16 }
  0xbf   :  { %v370_v24 = vcombine.low %v361_v39, %v368_v23 }
  0xc1   :  { %v384_v10 = vrot.slane %v370_v24, %v346_v16 }
  0xc3   :  { %v385_v21 = vcombine.low %v377_v25, %v384_v10 }
  0xc5   :  { %391 = vst.msk [vmem:[#allocation2] sm:$0xff] %vm389_vm1, %v385_v21 }
  0xc6   :  { %432 = shalt.err (!%p429_p4)
}
  0xc7   :  { %401 = dma.vmem_to_hbm [thread:$0]  %s399_s1, 128, %s589_s2, [#allocation3]  }
  0xc8   :  { %441 = dma.done.wait [#allocation3], 128  }
  0xc9   :  { %442 = vsyncadd [#allocation3], 4294967168 }
  0xca   :  { %405 = vsyncpa [#allocation3], 1 }

</bundles_post_ra>
